<compile_context>
chip_gen: v7x
topology: tpu7x:2x2x1
jax: 0.10.0
libtpu: 0.0.40
codegen_flags: <defaults>
</compile_context>

<pallas_src>
import functools

import jax
import jax.numpy as jnp
from jax.experimental import pallas as pl
from jax.experimental.pallas import tpu as pltpu


def _round_up(x, m):
    return (x + m - 1) // m * m


def _conv_gemm_relu_kernel(p_ref, w_ref, b_ref, o_ref):
    """One (TM, TN) output tile; accumulates directly in o_ref over the K axis."""
    kk = pl.program_id(2)
    prod = jnp.dot(p_ref[...], w_ref[...], preferred_element_type=jnp.float32)

    @pl.when(kk == 0)
    def _():
        o_ref[...] = prod

    @pl.when(kk > 0)
    def _():
        o_ref[...] += prod

    @pl.when(kk == pl.num_programs(2) - 1)
    def _():
        o_ref[...] = jnp.maximum(o_ref[...] + b_ref[...], 0.0)   # fused bias+ReLU


def _vmem_limit_bytes(tile_bytes):
    """Per-generation VMEM limit: physical capacity minus compiler headroom."""
    phys = 64 << 20                                   # v7x per-core floor
    try:
        phys = int(pltpu.get_tpu_info().vmem_capacity_bytes)
    except Exception:
        pass
    budget = max(32 << 20, phys - (16 << 20))         # leave headroom for scratch
    return int(min(max(tile_bytes, 32 << 20), budget))


def _im2col_nhwc(x_nhwc, kh, kw, stride, padding):
    """Lower NHWC input to [N*OH*OW, KH*KW*C] patches (glue, plain JAX, bf16)."""
    # TODO(synk): fully fuse im2col into the kernel (kh*kw-indexed manual DMA of
    # shifted windows from an HBM-resident input) to remove the KH*KW read
    # amplification of this materialized intermediate; kept as bf16 XLA glue
    # here for lowering robustness across kernel sizes / strides.
    n, h, w, c = x_nhwc.shape
    xp = jnp.pad(x_nhwc, ((0, 0), (padding, padding), (padding, padding), (0, 0)))
    oh = (h + 2 * padding - kh) // stride + 1
    ow = (w + 2 * padding - kw) // stride + 1
    cols = []
    for i in range(kh):
        for j in range(kw):
            cols.append(xp[:, i:i + stride * oh:stride, j:j + stride * ow:stride, :])
    patches = jnp.concatenate(cols, axis=-1)                 # (N, OH, OW, KH*KW*C)
    return patches.reshape(n * oh * ow, kh * kw * c), oh, ow


@functools.partial(jax.jit, static_argnames=("stride", "padding"))
def basic_conv2d(x_nchw, weight_oihw, bias, *, stride=1, padding=0):
    """Conv2d(stride, padding) + ReLU forward, matching nn.Conv2d semantics."""
    n, c_in, h, w = x_nchw.shape
    oc, c_in_w, kh, kw = weight_oihw.shape
    assert c_in == c_in_w

    # bf16 BEFORE im2col/pad: the dominant materialized intermediate is bf16.
    # Accumulation stays f32 inside the kernel.
    x_nhwc = jnp.transpose(x_nchw, (0, 2, 3, 1)).astype(jnp.bfloat16)
    patches, oh, ow = _im2col_nhwc(x_nhwc, kh, kw, stride, padding)    # (M, K)
    m, k = patches.shape

    # PyTorch weight (OC, IC, KH, KW) -> (KH, KW, IC, OC) -> (K, OC), bf16,
    # matching the (kh, kw, c) ordering of the patches above.
    w_mat = jnp.transpose(weight_oihw.astype(jnp.bfloat16),
                          (2, 3, 1, 0)).reshape(kh * kw * c_in, oc)
    b_mat = bias.reshape(1, oc).astype(jnp.float32)

    # ---- Tiling -------------------------------------------------------------
    # OC tile: one lane-dense tile when padded OC <= 512 (weights resident in
    # VMEM, patches streamed once; >=256 wide for v6e/v7x MXUs), else 256.
    ocp128 = _round_up(oc, 128)
    tn = ocp128 if ocp128 <= 512 else 256
    ocp = _round_up(oc, tn)
    n_oc_tiles = ocp // tn

    # K tile: up to 512; K zero-padded up to a multiple of TK (numerically free).
    tk = min(512, _round_up(k, 128))
    kp = _round_up(k, tk)

    # M tile: multiple of 16 (bf16 sublane packing), up to 1024; keep the
    # parallel grid >= 2 tiles when possible so both v7x TensorCores get work.
    m16 = _round_up(m, 16)
    if m16 <= 1024:
        if n_oc_tiles == 1 and m16 >= 32:
            tm = _round_up((m16 + 1) // 2, 16)
        else:
            tm = m16
    elif m16 <= 2048:
        tm = 512
    else:
        tm = 1024
    m_pad = _round_up(m, tm)

    # Zero padding is numerically free: padded K rows/cols are zero, padded OC
    # columns carry zero weight and zero bias, padded M rows are sliced off.
    patches = jnp.pad(patches, ((0, m_pad - m), (0, kp - k)))
    w_mat = jnp.pad(w_mat, ((0, kp - k), (0, ocp - oc)))
    b_mat = jnp.pad(b_mat, ((0, 0), (0, ocp - oc)))

    grid = (m_pad // tm, ocp // tn, kp // tk)

    # VMEM: double-buffered bf16 inputs + double-buffered f32 output tiles,
    # plus margin for compiler-internal scratch.  Well under v7x's 64 MiB.
    tile_bytes = (2 * (tm * tk + tk * tn) * 2 + 2 * tn * 4
                  + 2 * tm * tn * 4 + (8 << 20))

    cost = pl.CostEstimate(
        flops=2 * m_pad * kp * ocp,
        transcendentals=0,
        bytes_accessed=int(m_pad * kp * 2 * n_oc_tiles + kp * ocp * 2
                           + ocp * 4 + m_pad * ocp * 4),
    )

    out = pl.pallas_call(
        _conv_gemm_relu_kernel,
        out_shape=jax.ShapeDtypeStruct((m_pad, ocp), jnp.float32),
        grid_spec=pltpu.PrefetchScalarGridSpec(
            num_scalar_prefetch=0,
            grid=grid,
            in_specs=[
                pl.BlockSpec((tm, tk), lambda i, j, kk: (i, kk)),
                pl.BlockSpec((tk, tn), lambda i, j, kk: (kk, j)),
                pl.BlockSpec((1, tn), lambda i, j, kk: (0, j)),
            ],
            out_specs=pl.BlockSpec((tm, tn), lambda i, j, kk: (i, j)),
        ),
        compiler_params=pltpu.CompilerParams(
            dimension_semantics=("parallel", "parallel", "arbitrary"),
            vmem_limit_bytes=_vmem_limit_bytes(tile_bytes),
        ),
        cost_estimate=cost,
    )(patches, w_mat, b_mat)

    # TODO(synk): in a full network keep activations NHWC between layers and
    # fold this slice + transpose into the consumer; done here only to match
    # nn.Conv2d's NCHW output semantics.
    out = out[:m, :oc]
    out_nhwc = out.reshape(n, oh, ow, oc)
    return jnp.transpose(out_nhwc, (0, 3, 1, 2)).astype(x_nchw.dtype)


if __name__ == "__main__":
    # BasicConv2d(in_channels=4, out_channels=8, kernel_size=3, stride=1, padding=1)
    in_channels, out_channels, kernel_size, stride, padding = 4, 8, 3, 1, 1
    batch, spatial = 2, 16

    key = jax.random.PRNGKey(0)
    kx, kw_, kb = jax.random.split(key, 3)

    x = jax.random.normal(kx, (batch, in_channels, spatial, spatial), dtype=jnp.float32)
    weight = jax.random.normal(
        kw_, (out_channels, in_channels, kernel_size, kernel_size), dtype=jnp.float32
    ) * 0.1
    bias = jax.random.normal(kb, (out_channels,), dtype=jnp.float32) * 0.1

    y = basic_conv2d(x, weight, bias, stride=stride, padding=padding)
    jax.block_until_ready(y)
    assert y.shape == (batch, out_channels, spatial, spatial)

    def ref_conv_relu(xx, ww):
        r = jax.lax.conv_general_dilated(
            xx, ww, window_strides=(stride, stride),
            padding=[(padding, padding), (padding, padding)],
            dimension_numbers=("NCHW", "OIHW", "NCHW"),
        ) + bias.reshape(1, -1, 1, 1)
        return jnp.maximum(r, 0.0)

    # Strict check: reference using the same bf16-rounded operands (f32 accum).
    ref_bf16 = ref_conv_relu(
        x.astype(jnp.bfloat16).astype(jnp.float32),
        weight.astype(jnp.bfloat16).astype(jnp.float32),
    )
    assert jnp.allclose(y, ref_bf16, atol=1e-3, rtol=1e-3)

    # Loose check: full-f32 reference (difference is only bf16 operand rounding).
    ref_f32 = ref_conv_relu(x, weight)
    assert jnp.allclose(y, ref_f32, atol=5e-2, rtol=5e-2)

    print("KERNEL_OK")
</pallas_src>

<mosaic_0001>
module attributes {stable_mosaic.version = 11 : i64} {
  func.func @_conv_gemm_relu_kernel(%arg0: i32, %arg1: i32, %arg2: i32, %arg3: memref<256x128xbf16, #tpu.memory_space<vmem>>, %arg4: memref<128x128xbf16, #tpu.memory_space<vmem>>, %arg5: memref<1x128xf32, #tpu.memory_space<vmem>>, %arg6: memref<256x128xf32, #tpu.memory_space<vmem>>) attributes {dimension_semantics = [#tpu.dimension_semantics<parallel>, #tpu.dimension_semantics<parallel>, #tpu.dimension_semantics<arbitrary>], iteration_bounds = array<i64: 2, 1, 1>, scalar_prefetch = 0 : i64, scratch_operands = 0 : i64, tpu.core_type = #tpu.core_type<tc>, window_params = [{transform_indices = @transform_0, window_bounds = array<i64: 256, 128>}, {transform_indices = @transform_1, window_bounds = array<i64: 128, 128>}, {transform_indices = @transform_2, window_bounds = array<i64: 1, 128>}, {transform_indices = @transform_3, window_bounds = array<i64: 256, 128>}]} {
    %c0 = arith.constant 0 : index
    %c0_0 = arith.constant 0 : index
    %0 = vector.load %arg3[%c0, %c0_0] : memref<256x128xbf16, #tpu.memory_space<vmem>>, vector<256x128xbf16>
    %c0_1 = arith.constant 0 : index
    %c0_2 = arith.constant 0 : index
    %1 = vector.load %arg4[%c0_1, %c0_2] : memref<128x128xbf16, #tpu.memory_space<vmem>>, vector<128x128xbf16>
    %cst = arith.constant dense<0.000000e+00> : vector<256x128xf32>
    %2 = tpu.matmul %0, %1, %cst {dimension_numbers = #tpu.dot_dimension_numbers<[1], [0], [0], [1], [0, 0, 1, 1], [], []>} : vector<256x128xbf16>, vector<128x128xbf16>, vector<256x128xf32> -> vector<256x128xf32>
    %c0_i32 = arith.constant 0 : i32
    %3 = arith.cmpi eq, %arg2, %c0_i32 : i32
    %4 = arith.extui %3 : i1 to i32
    %c0_i32_3 = arith.constant 0 : i32
    %5 = arith.cmpi ne, %4, %c0_i32_3 : i32
    scf.if %5 {
      %c0_8 = arith.constant 0 : index
      %c0_9 = arith.constant 0 : index
      %12 = vector.load %arg6[%c0_8, %c0_9] : memref<256x128xf32, #tpu.memory_space<vmem>>, vector<256x128xf32>
      tpu.vector_store %arg6[%c0_8, %c0_9], %2 {strides = array<i32>} : memref<256x128xf32, #tpu.memory_space<vmem>>, vector<256x128xf32>,
    } else {
    }
    %c0_i32_4 = arith.constant 0 : i32
    %6 = arith.cmpi sgt, %arg2, %c0_i32_4 : i32
    %7 = arith.extui %6 : i1 to i32
    %c0_i32_5 = arith.constant 0 : i32
    %8 = arith.cmpi ne, %7, %c0_i32_5 : i32
    scf.if %8 {
      %c0_8 = arith.constant 0 : index
      %c0_9 = arith.constant 0 : index
      %12 = vector.load %arg6[%c0_8, %c0_9] : memref<256x128xf32, #tpu.memory_space<vmem>>, vector<256x128xf32>
      %13 = arith.addf %12, %2 : vector<256x128xf32>
      %c0_10 = arith.constant 0 : index
      %c0_11 = arith.constant 0 : index
      %14 = vector.load %arg6[%c0_10, %c0_11] : memref<256x128xf32, #tpu.memory_space<vmem>>, vector<256x128xf32>
      tpu.vector_store %arg6[%c0_10, %c0_11], %13 {strides = array<i32>} : memref<256x128xf32, #tpu.memory_space<vmem>>, vector<256x128xf32>,
    } else {
    }
    %c0_i32_6 = arith.constant 0 : i32
    %9 = arith.cmpi eq, %arg2, %c0_i32_6 : i32
    %10 = arith.extui %9 : i1 to i32
    %c0_i32_7 = arith.constant 0 : i32
    %11 = arith.cmpi ne, %10, %c0_i32_7 : i32
    scf.if %11 {
      %c0_8 = arith.constant 0 : index
      %c0_9 = arith.constant 0 : index
      %12 = vector.load %arg6[%c0_8, %c0_9] : memref<256x128xf32, #tpu.memory_space<vmem>>, vector<256x128xf32>
      %c0_10 = arith.constant 0 : index
      %c0_11 = arith.constant 0 : index
      %13 = vector.load %arg5[%c0_10, %c0_11] : memref<1x128xf32, #tpu.memory_space<vmem>>, vector<1x128xf32>
      %14 = vector.broadcast %13 : vector<1x128xf32> to vector<256x128xf32>
      %15 = arith.addf %12, %14 : vector<256x128xf32>
      %cst_12 = arith.constant 0.000000e+00 : f32
      %16 = vector.broadcast %cst_12 : f32 to vector<256x128xf32>
      %17 = arith.maximumf %15, %16 : vector<256x128xf32>
      %c0_13 = arith.constant 0 : index
      %c0_14 = arith.constant 0 : index
      %18 = vector.load %arg6[%c0_13, %c0_14] : memref<256x128xf32, #tpu.memory_space<vmem>>, vector<256x128xf32>
      tpu.vector_store %arg6[%c0_13, %c0_14], %17 {strides = array<i32>} : memref<256x128xf32, #tpu.memory_space<vmem>>, vector<256x128xf32>,
    } else {
    }
    return
  }
  func.func @transform_0(%arg0: i32, %arg1: i32, %arg2: i32) -> (i32, i32) {
    %c0_i32 = arith.constant 0 : i32
    return %arg0, %arg2 : i32, i32
  }
  func.func @transform_1(%arg0: i32, %arg1: i32, %arg2: i32) -> (i32, i32) {
    %c0_i32 = arith.constant 0 : i32
    return %arg2, %arg1 : i32, i32
  }
  func.func @transform_2(%arg0: i32, %arg1: i32, %arg2: i32) -> (i32, i32) {
    %c0_i32 = arith.constant 0 : i32
    %c0_i32_0 = arith.constant 0 : i32
    return %c0_i32, %arg1 : i32, i32
  }
  func.func @transform_3(%arg0: i32, %arg1: i32, %arg2: i32) -> (i32, i32) {
    %c0_i32 = arith.constant 0 : i32
    return %arg0, %arg1 : i32, i32
  }
}

</mosaic_0001>

<bundles_post_ra>
// kernel: basic_conv2d.1
= control target key start
LH: loop header
LB: loop body
LE: loop exit
PB: predicated region body
PF: predicated region fallthrough
CT: control target
= control target key end

     0   :  { %s1216_s12 = smov 0   ;;  %s1218_s13 = smov 0   ;;  %s1366_s0 = inlined_call_operand.vmem [shape: bf16[512,128], index: 0, kind: input, shape index: {}]   ;;  %s1367_s1 = inlined_call_operand.vmem [shape: bf16[128,128], index: 1, kind: input, shape index: {}]   ;;  %s1368_s2 = inlined_call_operand.vmem [shape: f32[1,128], index: 2, kind: input, shape index: {}]   ;;  %s1369_s3 = inlined_call_operand.vmem [shape: f32[512,128], index: 3, kind: output, shape index: {}]  }
   0x1   :  { %s1220_s14 = smov 0  }
   0x2 LB: > { %s32_s15 = sadd.s32 1, %s1190_s13  ;;  %p1004_p0 = scmp.ge.s32.totalorder %s1194_s14, 1  ;;  %s1194_s14 = sphi %s1220_s14, %s13_s14   ;;  %s1190_s13 = sphi %s1218_s13, %s1371_s13   ;;  %s1186_s12 = sphi %s1216_s12, %s1370_s12  }
   0x3   : > { %p34_p1 = scmp.ge.s32.totalorder %s32_s15, 2  ;;  %p188_p2 = scmp.lt.s32.totalorder %s1194_s14, 3 }
   0x5   : > { %s1373_s15 = smov (%p34_p1, %s32_s15), 0  ;;  %p189_p3 = pnand %p1004_p0, %p188_p2 }
   0x6   : > { %v1148_v0 = vld [vmem:[%s1367_s1] sm:$0xff] (!%p189_p3)   ;;  %s1005_s18 = sshll.u32 (!%p189_p3), %s1186_s12, 5  ;;  %v1149_v1 = vld [vmem:[%s1367_s1 + $0x8] sm:$0xff] (!%p189_p3)   ;;  %v1150_v2 = vld [vmem:[%s1367_s1 + $0x10] sm:$0xff] (!%p189_p3)  }
   0x7   : > { %192 = sbr.rel (%p189_p3) target bundleno = 283 (0x11b), region = 32  ;;  %p230_p4 = scmp.lt.s32.totalorder (!%p189_p3), %s1005_s18, 63  ;;  %1060 = vmatprep.subr.bf16.mxu0 (!%p189_p3), %v1148_v0  ;;  %1108 = vmatprep.subr.bf16.mxu1 (!%p189_p3), %v1148_v0  ;;  %v1151_v3 = vld [vmem:[%s1367_s1 + $0x18] sm:$0xff] (!%p189_p3)   ;;  %v1152_v6 = vld [vmem:[%s1367_s1 + $0x20] sm:$0xff] (!%p189_p3)   ;;  %v1153_v7 = vld [vmem:[%s1367_s1 + $0x28] sm:$0xff] (!%p189_p3)  }
   0x8   : > { %1061 = vmatpush3.bf16.msra.mxu0 (!%p189_p3), %v1148_v0  ;;  %1116 = vmatpush3.bf16.msra.mxu1 (!%p189_p3), %v1148_v0  ;;  %v1154_v8 = vld [vmem:[%s1367_s1 + $0x30] sm:$0xff] (!%p189_p3)   ;;  %v1155_v9 = vld [vmem:[%s1367_s1 + $0x38] sm:$0xff] (!%p189_p3)   ;;  %v1285_v24 = vld [vmem:[%s1368_s2] ss:$0 sm:$0xff] (!%p189_p3) }
   0x9   : > { %1062 = vmatprep.subr.bf16.mxu0 (!%p189_p3), %v1149_v1  ;;  %1109 = vmatprep.subr.bf16.mxu1 (!%p189_p3), %v1149_v1 }
   0xc   : > { %1063 = vmatpush3.bf16.msra.mxu0 (!%p189_p3), %v1149_v1  ;;  %1117 = vmatpush3.bf16.msra.mxu1 (!%p189_p3), %v1149_v1 }
   0xd   : > { %1064 = vmatprep.subr.bf16.mxu0 (!%p189_p3), %v1150_v2  ;;  %1110 = vmatprep.subr.bf16.mxu1 (!%p189_p3), %v1150_v2 }
   0xe   : > { %s1375_s18 = smov (!%p230_p4, %s1005_s18), 63 }
   0xf   : > { %s1006_s23 = sshll.u32 %s1375_s18, 2  ;;  %s1008_s12 = sshll.u32 %s1375_s18, 3 }
  0x10   : > { %s1249_s26 = scalar_lea.vmem %s1366_s0, %s1006_s23  ;;  %1065 = vmatpush3.bf16.msra.mxu0 %v1150_v2  ;;  %1118 = vmatpush3.bf16.msra.mxu1 %v1150_v2  ;;  %s1293_s19 = scalar_lea.vmem %s1369_s3, %s1008_s12 }
  0x11   : > { %v1156_v4 = vld [vmem:[%s1249_s26] sm:$0xff]   ;;  %1066 = vmatprep.subr.bf16.mxu0 %v1151_v3  ;;  %1111 = vmatprep.subr.bf16.mxu1 %v1151_v3  ;;  %v1158_v10 = vld [vmem:[%s1249_s26 + $0x8] sm:$0xff]   ;;  %v1160_v12 = vld [vmem:[%s1249_s26 + $0x10] sm:$0xff]  }
  0x12   : > { %v1157_v5 = vld [vmem:[%s1249_s26 + $0x40] sm:$0xff]   ;;  %1076 = vmatprep.mubr.bf16.mxu0 %v1156_v4  ;;  %v1159_v11 = vld [vmem:[%s1249_s26 + $0x48] sm:$0xff]   ;;  %v1161_v13 = vld [vmem:[%s1249_s26 + $0x50] sm:$0xff]  }
  0x13   : > { %1092 = vmatprep.mubr.bf16.mxu1 %v1157_v5  ;;  %v1162_v14 = vld [vmem:[%s1249_s26 + $0x18] sm:$0xff]   ;;  %v1164_v16 = vld [vmem:[%s1249_s26 + $0x20] sm:$0xff]   ;;  %v1166_v18 = vld [vmem:[%s1249_s26 + $0x28] sm:$0xff]  }
  0x14   : > { %1067 = vmatpush3.bf16.msra.mxu0 %v1151_v3  ;;  %1119 = vmatpush3.bf16.msra.mxu1 %v1151_v3  ;;  %v1163_v15 = vld [vmem:[%s1249_s26 + $0x58] sm:$0xff]   ;;  %v1165_v17 = vld [vmem:[%s1249_s26 + $0x60] sm:$0xff]   ;;  %v1167_v19 = vld [vmem:[%s1249_s26 + $0x68] sm:$0xff]  }
  0x15   : > { %1068 = vmatprep.subr.bf16.mxu0 %v1152_v6  ;;  %1112 = vmatprep.subr.bf16.mxu1 %v1152_v6  ;;  %v1168_v20 = vld [vmem:[%s1249_s26 + $0x30] sm:$0xff]   ;;  %v1170_v22 = vld [vmem:[%s1249_s26 + $0x38] sm:$0xff]  }
  0x16   : > { %v1169_v21 = vld [vmem:[%s1249_s26 + $0x70] sm:$0xff]   ;;  %v1171_v23 = vld [vmem:[%s1249_s26 + $0x78] sm:$0xff]  }
  0x18   : > { %1069 = vmatpush3.bf16.msra.mxu0 %v1152_v6  ;;  %1120 = vmatpush3.bf16.msra.mxu1 %v1152_v6 }
  0x19   : > { %1070 = vmatprep.subr.bf16.mxu0 %v1153_v7  ;;  %1113 = vmatprep.subr.bf16.mxu1 %v1153_v7 }
  0x1c   : > { %1071 = vmatpush3.bf16.msra.mxu0 %v1153_v7  ;;  %1121 = vmatpush3.bf16.msra.mxu1 %v1153_v7 }
  0x1d   : > { %1072 = vmatprep.subr.bf16.mxu0 %v1154_v8  ;;  %1114 = vmatprep.subr.bf16.mxu1 %v1154_v8 }
  0x20   : > { %1073 = vmatpush3.bf16.msra.mxu0 %v1154_v8  ;;  %1122 = vmatpush3.bf16.msra.mxu1 %v1154_v8 }
  0x21   : > { %1074 = vmatprep.subr.bf16.mxu0 %v1155_v9  ;;  %1115 = vmatprep.subr.bf16.mxu1 %v1155_v9 }
  0x24   : > { %1075 = vmatpush3.bf16.msra.mxu0 %v1155_v9  ;;  %1123 = vmatpush3.bf16.msra.mxu1 %v1155_v9 }
  0x27   : > { %1077 = vmatmul.mubr.bf16.vlgmr.msra.gmra.mrb[0].mxu0 %v1158_v10  ;;  %1093 = vmatmul.mubr.bf16.vlgmr.msra.gmra.mrb[0].mxu1 %v1159_v11 }
  0x28   : > { %1080 = vmatprep.mubr.bf16.mxu0 %v1160_v12  ;;  %1096 = vmatprep.mubr.bf16.mxu1 %v1161_v13 }
  0x2f   : > { %1081 = vmatmul.mubr.bf16.gmra.mrb[4].mxu0 %v1162_v14  ;;  %1097 = vmatmul.mubr.bf16.gmra.mrb[4].mxu1 %v1163_v15 }
  0x30   : > { %1084 = vmatprep.mubr.bf16.mxu0 %v1164_v16  ;;  %1100 = vmatprep.mubr.bf16.mxu1 %v1165_v17 }
  0x37   : > { %1085 = vmatmul.mubr.bf16.gmra.mrb[8].mxu0 %v1166_v18  ;;  %1101 = vmatmul.mubr.bf16.gmra.mrb[8].mxu1 %v1167_v19 }
  0x38   : > { %1088 = vmatprep.mubr.bf16.mxu0 %v1168_v20  ;;  %1104 = vmatprep.mubr.bf16.mxu1 %v1169_v21 }
  0x3f   : > { %1089 = vmatmul.mubr.bf16.gmra.mrb[12].mxu0 %v1170_v22  ;;  %1105 = vmatmul.mubr.bf16.gmra.mrb[12].mxu1 %v1171_v23 }
  0xfa   : > { %v1078_v25 = vpop.f32.mrb[0].mxu0  ;;  %v1094_v26 = vpop.f32.mrb[0].mxu1 }
  0xfb   : > { %v793_v27 = vadd.f32 %v1078_v25, %v1285_v24  ;;  %v809_v28 = vadd.f32 %v1094_v26, %v1285_v24  ;;  %v486_v29 = vpop.f32.mrb[1].mxu0  ;;  %v550_v30 = vpop.f32.mrb[1].mxu1 }
  0xfc   : > { %v791_v31 = vadd.f32 %v1285_v24, %v486_v29  ;;  %v807_v32 = vadd.f32 %v1285_v24, %v550_v30  ;;  %v1079_v33 = vpop.f32.mrb[2].mxu0  ;;  %v1095_v34 = vpop.f32.mrb[2].mxu1 }
  0xfd   : > { %v825_v35 = vmax.f32 %v793_v27, 0.0  ;;  %v841_v36 = vmax.f32 %v809_v28, 0.0  ;;  %v794_v37 = vadd.f32 %v1079_v33, %v1285_v24  ;;  %v810_v38 = vadd.f32 %v1095_v34, %v1285_v24  ;;  %v489_v39 = vpop.f32.mrb[3].mxu0  ;;  %v553_v40 = vpop.f32.mrb[3].mxu1 }
  0xfe   : > { %v823_v41 = vmax.f32 %v791_v31, 0.0  ;;  %v839_v42 = vmax.f32 %v807_v32, 0.0  ;;  %v792_v43 = vadd.f32 %v1285_v24, %v489_v39  ;;  %v808_v44 = vadd.f32 %v1285_v24, %v553_v40 }
  0xff   : > { %857 = vst [vmem:[%s1293_s19 + $0x10] sm:$0xff] %v825_v35  ;;  %873 = vst [vmem:[%s1293_s19 + $0x90] sm:$0xff] %v841_v36  ;;  %v826_v45 = vmax.f32 %v794_v37, 0.0  ;;  %v842_v46 = vmax.f32 %v810_v38, 0.0 }
 0x100   : > { %855 = vst [vmem:[%s1293_s19] sm:$0xff] %v823_v41  ;;  %871 = vst [vmem:[%s1293_s19 + $0x80] sm:$0xff] %v839_v42  ;;  %v824_v47 = vmax.f32 %v792_v43, 0.0  ;;  %v840_v48 = vmax.f32 %v808_v44, 0.0 }
 0x101   : > { %858 = vst [vmem:[%s1293_s19 + $0x18] sm:$0xff] %v826_v45  ;;  %874 = vst [vmem:[%s1293_s19 + $0x98] sm:$0xff] %v842_v46 }
 0x102   : > { %856 = vst [vmem:[%s1293_s19 + $0x8] sm:$0xff] %v824_v47  ;;  %872 = vst [vmem:[%s1293_s19 + $0x88] sm:$0xff] %v840_v48  ;;  %v1082_v49 = vpop.f32.mrb[4].mxu0  ;;  %v1098_v50 = vpop.f32.mrb[4].mxu1 }
 0x103   : > { %v797_v51 = vadd.f32 %v1082_v49, %v1285_v24  ;;  %v813_v52 = vadd.f32 %v1098_v50, %v1285_v24  ;;  %v502_v53 = vpop.f32.mrb[5].mxu0  ;;  %v566_v54 = vpop.f32.mrb[5].mxu1 }
 0x104   : > { %v795_v55 = vadd.f32 %v1285_v24, %v502_v53  ;;  %v811_v56 = vadd.f32 %v1285_v24, %v566_v54  ;;  %v1083_v57 = vpop.f32.mrb[6].mxu0  ;;  %v1099_v58 = vpop.f32.mrb[6].mxu1 }
 0x105   : > { %v829_v59 = vmax.f32 %v797_v51, 0.0  ;;  %v845_v60 = vmax.f32 %v813_v52, 0.0  ;;  %v798_v61 = vadd.f32 %v1083_v57, %v1285_v24  ;;  %v814_v62 = vadd.f32 %v1099_v58, %v1285_v24  ;;  %v505_v63 = vpop.f32.mrb[7].mxu0  ;;  %v569_v0 = vpop.f32.mrb[7].mxu1 }
 0x106   : > { %v827_v1 = vmax.f32 %v795_v55, 0.0  ;;  %v843_v2 = vmax.f32 %v811_v56, 0.0  ;;  %v796_v3 = vadd.f32 %v1285_v24, %v505_v63  ;;  %v812_v4 = vadd.f32 %v1285_v24, %v569_v0 }
 0x107   : > { %861 = vst [vmem:[%s1293_s19 + $0x30] sm:$0xff] %v829_v59  ;;  %877 = vst [vmem:[%s1293_s19 + $0xb0] sm:$0xff] %v845_v60  ;;  %v830_v5 = vmax.f32 %v798_v61, 0.0  ;;  %v846_v6 = vmax.f32 %v814_v62, 0.0 }
 0x108   : > { %859 = vst [vmem:[%s1293_s19 + $0x20] sm:$0xff] %v827_v1  ;;  %875 = vst [vmem:[%s1293_s19 + $0xa0] sm:$0xff] %v843_v2  ;;  %v828_v7 = vmax.f32 %v796_v3, 0.0  ;;  %v844_v8 = vmax.f32 %v812_v4, 0.0 }
 0x109   : > { %862 = vst [vmem:[%s1293_s19 + $0x38] sm:$0xff] %v830_v5  ;;  %878 = vst [vmem:[%s1293_s19 + $0xb8] sm:$0xff] %v846_v6 }
 0x10a   : > { %860 = vst [vmem:[%s1293_s19 + $0x28] sm:$0xff] %v828_v7  ;;  %876 = vst [vmem:[%s1293_s19 + $0xa8] sm:$0xff] %v844_v8  ;;  %v1086_v9 = vpop.f32.mrb[8].mxu0  ;;  %v1102_v10 = vpop.f32.mrb[8].mxu1 }
 0x10b   : > { %v801_v11 = vadd.f32 %v1086_v9, %v1285_v24  ;;  %v817_v12 = vadd.f32 %v1102_v10, %v1285_v24  ;;  %v518_v13 = vpop.f32.mrb[9].mxu0  ;;  %v582_v14 = vpop.f32.mrb[9].mxu1 }
 0x10c   : > { %v799_v15 = vadd.f32 %v1285_v24, %v518_v13  ;;  %v815_v16 = vadd.f32 %v1285_v24, %v582_v14  ;;  %v1087_v17 = vpop.f32.mrb[10].mxu0  ;;  %v1103_v18 = vpop.f32.mrb[10].mxu1 }
 0x10d   : > { %v833_v19 = vmax.f32 %v801_v11, 0.0  ;;  %v849_v20 = vmax.f32 %v817_v12, 0.0  ;;  %v802_v21 = vadd.f32 %v1087_v17, %v1285_v24  ;;  %v818_v22 = vadd.f32 %v1103_v18, %v1285_v24  ;;  %v521_v23 = vpop.f32.mrb[11].mxu0  ;;  %v585_v25 = vpop.f32.mrb[11].mxu1 }
 0x10e   : > { %v831_v26 = vmax.f32 %v799_v15, 0.0  ;;  %v847_v27 = vmax.f32 %v815_v16, 0.0  ;;  %v800_v28 = vadd.f32 %v1285_v24, %v521_v23  ;;  %v816_v29 = vadd.f32 %v1285_v24, %v585_v25 }
 0x10f   : > { %865 = vst [vmem:[%s1293_s19 + $0x50] sm:$0xff] %v833_v19  ;;  %881 = vst [vmem:[%s1293_s19 + $0xd0] sm:$0xff] %v849_v20  ;;  %v834_v30 = vmax.f32 %v802_v21, 0.0  ;;  %v850_v31 = vmax.f32 %v818_v22, 0.0 }
 0x110   : > { %863 = vst [vmem:[%s1293_s19 + $0x40] sm:$0xff] %v831_v26  ;;  %879 = vst [vmem:[%s1293_s19 + $0xc0] sm:$0xff] %v847_v27  ;;  %v832_v32 = vmax.f32 %v800_v28, 0.0  ;;  %v848_v33 = vmax.f32 %v816_v29, 0.0 }
 0x111   : > { %866 = vst [vmem:[%s1293_s19 + $0x58] sm:$0xff] %v834_v30  ;;  %882 = vst [vmem:[%s1293_s19 + $0xd8] sm:$0xff] %v850_v31 }
 0x112   : > { %864 = vst [vmem:[%s1293_s19 + $0x48] sm:$0xff] %v832_v32  ;;  %880 = vst [vmem:[%s1293_s19 + $0xc8] sm:$0xff] %v848_v33  ;;  %v1090_v34 = vpop.f32.mrb[12].mxu0  ;;  %v1106_v35 = vpop.f32.mrb[12].mxu1 }
 0x113   : > { %v805_v36 = vadd.f32 %v1090_v34, %v1285_v24  ;;  %v821_v37 = vadd.f32 %v1106_v35, %v1285_v24  ;;  %v534_v38 = vpop.f32.mrb[13].mxu0  ;;  %v598_v39 = vpop.f32.mrb[13].mxu1 }
 0x114   : > { %v803_v40 = vadd.f32 %v1285_v24, %v534_v38  ;;  %v819_v41 = vadd.f32 %v1285_v24, %v598_v39  ;;  %v1091_v42 = vpop.f32.mrb[14].mxu0  ;;  %v1107_v43 = vpop.f32.mrb[14].mxu1 }
 0x115   : > { %v837_v44 = vmax.f32 %v805_v36, 0.0  ;;  %v853_v45 = vmax.f32 %v821_v37, 0.0  ;;  %v806_v46 = vadd.f32 %v1091_v42, %v1285_v24  ;;  %v822_v47 = vadd.f32 %v1107_v43, %v1285_v24  ;;  %v537_v48 = vpop.f32.mrb[15].mxu0  ;;  %v601_v49 = vpop.f32.mrb[15].mxu1 }
 0x116   : > { %v835_v50 = vmax.f32 %v803_v40, 0.0  ;;  %v851_v51 = vmax.f32 %v819_v41, 0.0  ;;  %v804_v52 = vadd.f32 %v1285_v24, %v537_v48  ;;  %v820_v53 = vadd.f32 %v1285_v24, %v601_v49 }
 0x117   : > { %869 = vst [vmem:[%s1293_s19 + $0x70] sm:$0xff] %v837_v44  ;;  %885 = vst [vmem:[%s1293_s19 + $0xf0] sm:$0xff] %v853_v45  ;;  %v838_v54 = vmax.f32 %v806_v46, 0.0  ;;  %v854_v55 = vmax.f32 %v822_v47, 0.0 }
 0x118   : > { %867 = vst [vmem:[%s1293_s19 + $0x60] sm:$0xff] %v835_v50  ;;  %883 = vst [vmem:[%s1293_s19 + $0xe0] sm:$0xff] %v851_v51  ;;  %v836_v56 = vmax.f32 %v804_v52, 0.0  ;;  %v852_v57 = vmax.f32 %v820_v53, 0.0 }
 0x119   : > { %870 = vst [vmem:[%s1293_s19 + $0x78] sm:$0xff] %v838_v54  ;;  %886 = vst [vmem:[%s1293_s19 + $0xf8] sm:$0xff] %v854_v55 }
 0x11a   : > { %868 = vst [vmem:[%s1293_s19 + $0x68] sm:$0xff] %v836_v56  ;;  %884 = vst [vmem:[%s1293_s19 + $0xe8] sm:$0xff] %v852_v57 }
 0x11b PF: > { %s13_s14 = sadd.s32 1, %s1194_s14   ;;  %s1370_s12 = smov %s1190_s13 }
 0x11c   : > { %p10_p5 = scmp.ge.s32.totalorder %s13_s14, 4   ;;  %s1371_s13 = smov %s1373_s15 }
 0x11e   :  { %12 = sbr.rel (!%p10_p5) target bundleno = 2 (0x2), region = 80 }

</bundles_post_ra>
